<compile_context>
chip_gen: v5e
topology: v5e:2x2
jax: 0.10.0
libtpu: 0.0.40
codegen_flags: <defaults>
</compile_context>

<pallas_src>
import math
import functools

import jax
import jax.numpy as jnp
from jax.experimental import pallas as pl
from jax.experimental.pallas import tpu as pltpu


# ----------------------------------------------------------------------------
# Positional-encoding table (matches the torch buffer).
# ----------------------------------------------------------------------------
def make_pos_embedding(emb_size: int, maxlen: int = 5000) -> jnp.ndarray:
    """Sinusoidal positional-encoding table, shape (maxlen, 1, emb_size), f32."""
    assert emb_size % 2 == 0, "PositionalEncoding requires an even emb_size"
    den = jnp.exp(-jnp.arange(0, emb_size, 2, dtype=jnp.float32)
                  * (math.log(10000.0) / emb_size))            # (emb_size//2,)
    pos = jnp.arange(0, maxlen, dtype=jnp.float32)[:, None]     # (maxlen, 1)
    angles = pos * den[None, :]                                 # (maxlen, emb_size//2)
    pe = jnp.zeros((maxlen, emb_size), dtype=jnp.float32)
    pe = pe.at[:, 0::2].set(jnp.sin(angles))
    pe = pe.at[:, 1::2].set(jnp.cos(angles))
    return pe[:, None, :]                                       # (maxlen, 1, emb_size)


# ----------------------------------------------------------------------------
# Kernel: lane-dense broadcast-add, one slice-add per batch in the block.
# ----------------------------------------------------------------------------
def _posenc_kernel(x_ref, pe_ref, o_ref, *, emb: int, n_batch: int):
    # x_ref / o_ref: (tile_s, n_batch * emb)   lane-dense 2-D slabs
    # pe_ref:        (tile_s, emb)
    pe = pe_ref[...]
    for b in range(n_batch):                       # static unroll; slices are free views
        sl = slice(b * emb, (b + 1) * emb)
        o_ref[:, sl] = x_ref[:, sl] + pe


# ----------------------------------------------------------------------------
# Hardware-aware sizing.
# ----------------------------------------------------------------------------
@functools.lru_cache(maxsize=None)
def _hardware_defaults():
    vmem_cap = 128 << 20
    try:
        vmem_cap = int(pltpu.get_tpu_info().vmem_capacity_bytes)
    except Exception:
        try:
            kind = jax.devices()[0].device_kind.lower()
            if "v7" in kind:
                vmem_cap = 64 << 20
        except Exception:
            pass
    if vmem_cap <= (64 << 20):
        # v7x-class: 64 MiB physical VMEM, 2 TensorCores -> keep >=2 grid steps
        # so the "parallel" axis can shard across both cores.
        return {"target_block_bytes": 6 << 20,
                "vmem_limit_bytes": 48 << 20,
                "min_grid_steps": 2}
    # v5e / v6e: 128 MiB physical VMEM, 1 TensorCore.
    return {"target_block_bytes": 8 << 20,
            "vmem_limit_bytes": 64 << 20,
            "min_grid_steps": 1}


def _round_up(x: int, m: int) -> int:
    return ((x + m - 1) // m) * m


def _choose_tiles(S: int, B: int, E: int, itemsize: int, *,
                  target_block_bytes: int, min_grid_steps: int,
                  max_unroll: int = 64):
    """Pick (tile_s, chunk_b): sequence rows and batch columns per block."""
    row_full = B * E * itemsize

    # ---- lane (batch-chunk) tiling fallback ---------------------------------
    chunk_b = B
    need_lane_tiling = (8 * row_full > target_block_bytes) or (B > max_unroll)
    if need_lane_tiling and B > 1:
        # Chunk width (chunk_b * E elements) must be a multiple of 128 lanes
        # unless it spans the full row.
        lane_align = 128 // math.gcd(E, 128)          # batches per aligned lane group
        if lane_align <= B:
            by_bytes = max(1, target_block_bytes // (8 * E * itemsize))
            tgt = max(1, min(B, by_bytes, max_unroll))
            chunk_b = max(lane_align, (tgt // lane_align) * lane_align)
            if chunk_b >= B:
                chunk_b = B
        # else: E's lane alignment forces full-width rows.
        # TODO(synk): element-level lane tiling for huge, 128-misaligned E.

    # ---- sequence tiling -----------------------------------------------------
    row_bytes = max(1, chunk_b * E * itemsize)
    tile_s = max(1, target_block_bytes // row_bytes)
    if min_grid_steps > 1 and chunk_b == B:
        # v7x: cap so the grid has >=min_grid_steps steps (2 TensorCores).
        cap = max(8, _round_up(-(-S // min_grid_steps), 8))
        tile_s = min(tile_s, cap)
    if tile_s >= S:
        tile_s = S                     # single full block; no 8-divisibility needed
    else:
        tile_s = max(8, (tile_s // 8) * 8)   # tiled: keep sublane dim 8-aligned
    return tile_s, chunk_b


# ----------------------------------------------------------------------------
# Pallas launcher.
# ----------------------------------------------------------------------------
@functools.partial(jax.jit,
                   static_argnames=("tile_s", "chunk_b", "donate_input",
                                    "vmem_limit_bytes"))
def _forward_pallas(token_embedding, pos_embedding, *, tile_s: int, chunk_b: int,
                    donate_input: bool, vmem_limit_bytes: int):
    S, B, E = token_embedding.shape
    dtype = token_embedding.dtype

    # Slice + cast the positional table once (single-dtype add; callers should
    # hoist this to model init — here it constant-folds / fuses inside the jit).
    pe2d = pos_embedding[:S, 0, :].astype(dtype)          # (S, E)
    # Free view of the contiguous (S, B, E) array as a lane-dense 2-D slab.
    x2d = token_embedding.reshape(S, B * E)               # (S, B*E)

    grid = (pl.cdiv(S, tile_s), pl.cdiv(B, chunk_b))

    out2d = pl.pallas_call(
        functools.partial(_posenc_kernel, emb=E, n_batch=chunk_b),
        out_shape=jax.ShapeDtypeStruct((S, B * E), dtype),
        grid_spec=pltpu.PrefetchScalarGridSpec(
            num_scalar_prefetch=0,
            grid=grid,
            in_specs=[
                pl.BlockSpec((tile_s, chunk_b * E), lambda i, j: (i, j)),
                pl.BlockSpec((tile_s, E), lambda i, j: (i, 0)),
            ],
            out_specs=pl.BlockSpec((tile_s, chunk_b * E), lambda i, j: (i, j)),
        ),
        compiler_params=pltpu.CompilerParams(
            dimension_semantics=("parallel", "parallel"),
            vmem_limit_bytes=vmem_limit_bytes,
        ),
        input_output_aliases=({0: 0} if donate_input else {}),
    )(x2d, pe2d)

    return out2d.reshape(S, B, E)


_SMALL_BYPASS_BYTES = 256 * 1024


def positional_encoding_forward(token_embedding: jnp.ndarray,
                                pos_embedding: jnp.ndarray,
                                *,
                                tile_s: int | None = None,
                                chunk_b: int | None = None,
                                donate_input: bool = False,
                                force_pallas: bool = False) -> jnp.ndarray:
    """token_embedding: (S, B, E); pos_embedding: (maxlen, 1, E). Returns (S, B, E)."""
    S, B, E = token_embedding.shape
    itemsize = jnp.dtype(token_embedding.dtype).itemsize

    # Tiny problems: launch/pipeline overhead dominates — let XLA fuse the add.
    if not force_pallas and S * B * E * itemsize < _SMALL_BYPASS_BYTES:
        pe = pos_embedding[:S].astype(token_embedding.dtype)   # (S, 1, E)
        return token_embedding + pe

    hw = _hardware_defaults()
    if tile_s is None or chunk_b is None:
        auto_ts, auto_cb = _choose_tiles(
            S, B, E, itemsize,
            target_block_bytes=hw["target_block_bytes"],
            min_grid_steps=hw["min_grid_steps"])
        if tile_s is None:
            tile_s = auto_ts
        if chunk_b is None:
            chunk_b = auto_cb

    # Normalize / validate explicit overrides.
    chunk_b = int(chunk_b)
    if chunk_b <= 0 or chunk_b > B:
        chunk_b = B
    if chunk_b < B and (chunk_b * E) % 128 != 0:
        chunk_b = B                          # keep lane blocks 128-aligned
    tile_s = min(int(tile_s), S)
    if tile_s < S:
        tile_s = max(8, (tile_s // 8) * 8)   # keep sublane dim 8-aligned when tiling

    return _forward_pallas(token_embedding, pos_embedding,
                           tile_s=tile_s, chunk_b=chunk_b,
                           donate_input=bool(donate_input),
                           vmem_limit_bytes=hw["vmem_limit_bytes"])


# ----------------------------------------------------------------------------
# Self-test.
# ----------------------------------------------------------------------------
if __name__ == "__main__":
    # Small shapes consistent with the module: seq=8, batch=2, emb=32.
    S, B, E = 8, 2, 32
    key = jax.random.PRNGKey(0)
    x = jax.random.normal(key, (S, B, E), dtype=jnp.float32)
    pe = make_pos_embedding(E, maxlen=5000)
    ref = x + pe[:S]

    # 1) Main Pallas path (forced; the dispatcher would bypass at this size).
    out = jax.block_until_ready(positional_encoding_forward(x, pe, force_pallas=True))
    assert out.shape == (S, B, E)
    assert jnp.allclose(out, ref, atol=1e-6, rtol=1e-6)

    # 2) Ragged sequence (S not a multiple of tile_s) -> block masking.
    S2 = 13
    x2 = jax.random.normal(jax.random.PRNGKey(1), (S2, B, E), dtype=jnp.float32)
    out2 = jax.block_until_ready(
        positional_encoding_forward(x2, pe, tile_s=8, force_pallas=True))
    assert out2.shape == (S2, B, E)
    assert jnp.allclose(out2, x2 + pe[:S2], atol=1e-6, rtol=1e-6)

    # 3) Lane-tiled (batch-chunk) fallback: 2-D grid over (seq tiles, batch chunks).
    S3, B3, E3 = 16, 4, 128
    pe3 = make_pos_embedding(E3, maxlen=64)
    x3 = jax.random.normal(jax.random.PRNGKey(2), (S3, B3, E3), dtype=jnp.float32)
    out3 = jax.block_until_ready(
        positional_encoding_forward(x3, pe3, tile_s=8, chunk_b=2, force_pallas=True))
    assert jnp.allclose(out3, x3 + pe3[:S3], atol=1e-6, rtol=1e-6)

    # 4) In-place-style add via input/output aliasing.
    out4 = jax.block_until_ready(
        positional_encoding_forward(x, pe, force_pallas=True, donate_input=True))
    assert jnp.allclose(out4, ref, atol=1e-6, rtol=1e-6)

    # 5) Tiny-problem bypass (plain fused add).
    out5 = jax.block_until_ready(positional_encoding_forward(x, pe))
    assert jnp.allclose(out5, ref, atol=1e-6, rtol=1e-6)

    # Sanity checks on the auto-tiler (pure Python, no kernel launch).
    ts_a, cb_a = _choose_tiles(4096, 256, 512, 2,
                               target_block_bytes=6 << 20, min_grid_steps=2)
    assert ts_a % 8 == 0 or ts_a == 4096
    assert cb_a == 256 or (cb_a * 512) % 128 == 0

    print("KERNEL_OK")
</pallas_src>

<mosaic_0001>
module attributes {stable_mosaic.version = 11 : i64} {
  func.func @_posenc_kernel(%arg0: i32, %arg1: i32, %arg2: memref<8x64xf32, #tpu.memory_space<vmem>>, %arg3: memref<8x32xf32, #tpu.memory_space<vmem>>, %arg4: memref<8x64xf32, #tpu.memory_space<vmem>>) attributes {dimension_semantics = [#tpu.dimension_semantics<parallel>, #tpu.dimension_semantics<parallel>], iteration_bounds = array<i64: 1, 1>, scalar_prefetch = 0 : i64, scratch_operands = 0 : i64, tpu.core_type = #tpu.core_type<tc>, window_params = [{transform_indices = @transform_0, window_bounds = array<i64: 8, 64>}, {transform_indices = @transform_1, window_bounds = array<i64: 8, 32>}, {transform_indices = @transform_2, window_bounds = array<i64: 8, 64>}]} {
    %c0 = arith.constant 0 : index
    %c0_0 = arith.constant 0 : index
    %0 = vector.load %arg3[%c0, %c0_0] : memref<8x32xf32, #tpu.memory_space<vmem>>, vector<8x32xf32>
    %c0_1 = arith.constant 0 : index
    %c0_2 = arith.constant 0 : index
    %1 = vector.load %arg2[%c0_1, %c0_2] : memref<8x64xf32, #tpu.memory_space<vmem>>, vector<8x32xf32>
    %2 = arith.addf %1, %0 : vector<8x32xf32>
    %c0_3 = arith.constant 0 : index
    %c0_4 = arith.constant 0 : index
    %3 = vector.load %arg4[%c0_3, %c0_4] : memref<8x64xf32, #tpu.memory_space<vmem>>, vector<8x32xf32>
    tpu.vector_store %arg4[%c0_3, %c0_4], %2 {strides = array<i32>} : memref<8x64xf32, #tpu.memory_space<vmem>>, vector<8x32xf32>,
    %c0_5 = arith.constant 0 : index
    %c32 = arith.constant 32 : index
    %4 = vector.load %arg2[%c0_5, %c32] : memref<8x64xf32, #tpu.memory_space<vmem>>, vector<8x32xf32>
    %5 = arith.addf %4, %0 : vector<8x32xf32>
    %c0_6 = arith.constant 0 : index
    %c32_7 = arith.constant 32 : index
    %6 = vector.load %arg4[%c0_6, %c32_7] : memref<8x64xf32, #tpu.memory_space<vmem>>, vector<8x32xf32>
    tpu.vector_store %arg4[%c0_6, %c32_7], %5 {strides = array<i32>} : memref<8x64xf32, #tpu.memory_space<vmem>>, vector<8x32xf32>,
    return
  }
  func.func @transform_0(%arg0: i32, %arg1: i32) -> (i32, i32) {
    %c0_i32 = arith.constant 0 : i32
    return %arg0, %arg1 : i32, i32
  }
  func.func @transform_1(%arg0: i32, %arg1: i32) -> (i32, i32) {
    %c0_i32 = arith.constant 0 : i32
    %c0_i32_0 = arith.constant 0 : i32
    return %arg0, %c0_i32 : i32, i32
  }
  func.func @transform_2(%arg0: i32, %arg1: i32) -> (i32, i32) {
    %c0_i32 = arith.constant 0 : i32
    return %arg0, %arg1 : i32, i32
  }
}

</mosaic_0001>

<bundles_post_ra>
// kernel: _forward_pallas.1
= control target key start
LH: loop header
LB: loop body
LE: loop exit
PB: predicated region body
PF: predicated region fallthrough
CT: control target
= control target key end

     0   :  { %vm14_vm0 = vcmask 261120   ;;  %s29_s13 = smov 32   ;;  %vm22_vm1 = vcmask 523520   ;;  %s57_s0 = inlined_call_operand.vmem [shape: f32[8,64], index: 0, kind: input, shape index: {}]   ;;  %s58_s1 = inlined_call_operand.vmem [shape: f32[8,32], index: 1, kind: input, shape index: {}]   ;;  %s59_s2 = inlined_call_operand.vmem [shape: f32[8,64], index: 2, kind: output, shape index: {}]  }
   0x1   :  { %v11_v0 = vld [vmem:[%s58_s1] sm:$0xff] }
   0x2   :  { %v12_v1 = vld [vmem:[%s57_s0] sm:$0xff]  ;;  %18 = vrot.lane.b32.xlu0 %v11_v0, %s29_s13 }
   0x3   :  { %v13_v2 = vadd.f32 %v12_v1, %v11_v0 }
   0x5   :  { %15 = vst.msk [vmem:[%s59_s2] sm:$0xff] %vm14_vm0, %v13_v2 }
  0x74   :  { %v19_v3 = vpop.permute.xlu0 %18 }
  0x75   :  { %v21_v4 = vadd.f32 %v19_v3, %v12_v1 }
  0x77   :  { %23 = vst.msk [vmem:[%s59_s2] sm:$0xff] %vm22_vm1, %v21_v4 }

</bundles_post_ra>
